<compile_context>
chip_gen: v6e
topology: v6e:2x2x1
jax: 0.10.0
libtpu: 0.0.40
codegen_flags: <defaults>
</compile_context>

<pallas_src>
import functools

import jax
import jax.numpy as jnp
from jax import lax
from jax.experimental import pallas as pl
from jax.experimental.pallas import tpu as pltpu

GAMMA = 0.3
SMOOTH = 1e-06


def _explog_dice_kernel(logits_ref, targets_ref, inter_ref, union_ref,
                        inter_acc, union_acc, *, row_len, col_block, chunk):
    """Grid = (row_blocks, col_blocks); the column axis is the spatial reduction.

    Accumulators persist across the column axis (output index_map constant in j).
    Outputs are per-row partial sums: inter and union; final math is JAX glue.
    """
    j = pl.program_id(1)
    ncb = pl.cdiv(row_len, col_block)        # static python int
    last = ncb - 1                           # static
    rem = row_len - last * col_block         # static: valid cols in last block

    @pl.when(j == 0)
    def _init():
        inter_acc[...] = jnp.zeros_like(inter_acc)
        union_acc[...] = jnp.zeros_like(union_acc)

    acc_w = inter_acc.shape[-1]

    if acc_w != 128:
        # col_block == row_len and not a 128 multiple: one full-row block per
        # row, direct XLU reduce; no out-of-bounds columns possible.
        x = logits_ref[...].astype(jnp.float32)
        t = targets_ref[...].astype(jnp.float32)
        # sigmoid(x) == 0.5 * (tanh(0.5 x) + 1): a single EUP push per vreg.
        p = 0.5 * (jnp.tanh(0.5 * x) + 1.0)
        inter_acc[...] += jnp.sum(p * t, axis=-1, keepdims=True)
        union_acc[...] += jnp.sum(p + t, axis=-1, keepdims=True)
    else:
        def accumulate(valid_cols):
            # Static chunk loop: intermediates live only chunk-wide, one pass
            # over the tile, one accumulator RMW per chunk.
            for c in range(pl.cdiv(valid_cols, chunk)):
                lo = c * chunk
                x = logits_ref[:, lo:lo + chunk].astype(jnp.float32)
                t = targets_ref[:, lo:lo + chunk].astype(jnp.float32)
                p = 0.5 * (jnp.tanh(0.5 * x) + 1.0)
                pt = p * t
                u = p + t
                n_valid = min(chunk, valid_cols - lo)          # static
                if n_valid < chunk:
                    # Only the straddling chunk of the last column block pays
                    # for the mask (stale lanes of the partial input block).
                    idx = lax.broadcasted_iota(jnp.int32, pt.shape, 1)
                    keep = idx < n_valid
                    pt = jnp.where(keep, pt, 0.0)
                    u = jnp.where(keep, u, 0.0)
                # Lane-chunk partial fold: plain VPU adds; defer the
                # cross-lane XLU reduce to the finalize branch.
                ic = pt[:, 0:128]
                uc = u[:, 0:128]
                for k in range(1, chunk // 128):
                    ic = ic + pt[:, k * 128:(k + 1) * 128]
                    uc = uc + u[:, k * 128:(k + 1) * 128]
                inter_acc[...] += ic
                union_acc[...] += uc

        if rem == col_block:
            accumulate(col_block)            # every column block full: no mask
        else:
            @pl.when(j != last)
            def _full():
                accumulate(col_block)

            @pl.when(j == last)
            def _ragged():
                accumulate(rem)

    @pl.when(j == last)
    def _finalize():
        inter_ref[...] = jnp.sum(inter_acc[...], axis=-1, keepdims=True)
        union_ref[...] = jnp.sum(union_acc[...], axis=-1, keepdims=True)


def _round_up(x, m):
    return ((x + m - 1) // m) * m


def _plan(nc, hw, lg_dtype, tg_dtype):
    """Pick (split, rows, cols, row_block, col_block, chunk, acc_w)."""
    item_max = max(jnp.dtype(lg_dtype).itemsize, jnp.dtype(tg_dtype).itemsize)
    item_min = min(jnp.dtype(lg_dtype).itemsize, jnp.dtype(tg_dtype).itemsize)

    # dtype-native sublane multiple: packed sub-32-bit dtypes fill 16/32 rows.
    sub = {4: 8, 2: 16, 1: 32}.get(item_min, 8)

    # Split factor S (power of 2 dividing H*W): replicate rows by splitting the
    # spatial reduction so the "parallel" row axis has >= 2 sublane-full row
    # blocks even for tiny N*C (feeds both v7x TensorCores).  Free reshape.
    split = 1
    while (nc * split < 2 * sub and split < 8
           and hw % (2 * split) == 0 and hw // (2 * split) >= 128):
        split *= 2
    rows = nc * split
    cols = hw // split

    # Column (reduction) tile: whole row when small; otherwise prefer a
    # 128-multiple <= 4096 that divides cols (no masking at all), else 4096.
    if cols <= 4096:
        col_block = cols
    else:
        col_block = 4096
        for cb in range(4096, 127, -128):
            if cols % cb == 0:
                col_block = cb
                break
    if col_block % 128 == 0:
        chunk = 512 if col_block % 512 == 0 else (
            256 if col_block % 256 == 0 else 128)
        acc_w = 128
    else:
        chunk = col_block
        acc_w = 1

    # Row tile: ~2 MiB per double-buffered input block (streaming roofline is
    # flat past ~1 MiB), even number of row blocks for megacore balance.
    budget_bytes = 2 * 1024 * 1024
    rows_fit = max(sub, min(1024,
                            (budget_bytes // (col_block * item_max)) // sub * sub))
    if rows <= sub:
        row_block = rows                     # full-dim block (exempt from /sub)
    else:
        nblk = max(2, pl.cdiv(rows, rows_fit))
        if nblk % 2:
            nblk += 1
        row_block = min(rows_fit, _round_up(pl.cdiv(rows, nblk), sub))
    return split, rows, cols, row_block, col_block, chunk, acc_w


def exp_log_dice_loss(logits, targets, *, smooth=SMOOTH, gamma=GAMMA):
    """ExpLogDiceLoss forward.  logits/targets: (N, C, H, W), any float dtype."""
    N, C, H, W = logits.shape
    NC, HW = N * C, H * W

    split, rows, cols, row_block, col_block, chunk, acc_w = _plan(
        NC, HW, logits.dtype, targets.dtype)

    # Reshape only (contiguous, free); keep native dtypes - the f32 cast
    # happens chunk-wise inside the kernel.
    lg = logits.reshape(rows, cols)
    tg = targets.reshape(rows, cols)

    grid = (pl.cdiv(rows, row_block), pl.cdiv(cols, col_block))

    kernel = functools.partial(_explog_dice_kernel,
                               row_len=cols, col_block=col_block, chunk=chunk)

    inter, union = pl.pallas_call(
        kernel,
        out_shape=(jax.ShapeDtypeStruct((rows, 1), jnp.float32),
                   jax.ShapeDtypeStruct((rows, 1), jnp.float32)),
        grid=grid,
        in_specs=[
            pl.BlockSpec((row_block, col_block), lambda i, j: (i, j)),
            pl.BlockSpec((row_block, col_block), lambda i, j: (i, j)),
        ],
        out_specs=(
            pl.BlockSpec((row_block, 1), lambda i, j: (i, 0)),
            pl.BlockSpec((row_block, 1), lambda i, j: (i, 0)),
        ),
        scratch_shapes=[
            pltpu.VMEM((row_block, acc_w), jnp.float32),
            pltpu.VMEM((row_block, acc_w), jnp.float32),
        ],
        compiler_params=pltpu.CompilerParams(
            dimension_semantics=("parallel", "arbitrary"),
            vmem_limit_bytes=32 * 1024 * 1024,
        ),
    )(lg, tg)

    # Glue: recombine spatial splits, then dice / log / pow / mean over (N, C).
    inter = jnp.sum(inter.reshape(NC, split), axis=1)
    union = jnp.sum(union.reshape(NC, split), axis=1)
    dice = (2.0 * inter + smooth) / (union + smooth)
    # Analytically dice <= 1; clamp so fp rounding can never flip -log(dice)
    # negative -> NaN under the fractional power (intentional, documented
    # deviation from torch only in that pathological case).
    neg_log = jnp.maximum(-jnp.log(dice), 0.0)
    return jnp.mean(jnp.power(neg_log, gamma))


def _reference(logits, targets, smooth=SMOOTH, gamma=GAMMA):
    pred = jax.nn.sigmoid(logits.astype(jnp.float32))
    tgt = targets.astype(jnp.float32)
    inter = jnp.sum(pred * tgt, axis=(2, 3))
    union = jnp.sum(pred, axis=(2, 3)) + jnp.sum(tgt, axis=(2, 3))
    dice = (2 * inter + smooth) / (union + smooth)
    return jnp.mean(jnp.power(-jnp.log(dice), gamma))


if __name__ == "__main__":
    key = jax.random.PRNGKey(0)
    k1, k2, k3, k4 = jax.random.split(key, 4)

    # Main case: matches the module's intended NCHW use.
    N, C, H, W = 2, 4, 16, 16
    logits = jax.random.normal(k1, (N, C, H, W), dtype=jnp.float32)
    targets = (jax.random.uniform(k2, (N, C, H, W)) > 0.5).astype(jnp.float32)

    loss = exp_log_dice_loss(logits, targets)
    jax.block_until_ready(loss)
    ref = _reference(logits, targets)
    assert jnp.allclose(loss, ref, rtol=1e-5, atol=1e-5), (loss, ref)

    # Ragged case: N*C not a multiple of 8, H*W not a multiple of 128
    # (exercises full-dim blocks + the direct-reduce path, no NaN leak).
    logits2 = jax.random.normal(k3, (1, 3, 10, 12), dtype=jnp.float32)
    targets2 = (jax.random.uniform(k4, (1, 3, 10, 12)) > 0.5).astype(jnp.float32)
    loss2 = exp_log_dice_loss(logits2, targets2)
    jax.block_until_ready(loss2)
    ref2 = _reference(logits2, targets2)
    assert jnp.allclose(loss2, ref2, rtol=1e-5, atol=1e-5), (loss2, ref2)

    print("KERNEL_OK")
</pallas_src>

<mosaic_0001>
module attributes {stable_mosaic.version = 11 : i64} {
  func.func @_explog_dice_kernel(%arg0: i32, %arg1: i32, %arg2: memref<8x128xf32, #tpu.memory_space<vmem>>, %arg3: memref<8x128xf32, #tpu.memory_space<vmem>>, %arg4: memref<8x1xf32, #tpu.memory_space<vmem>>, %arg5: memref<8x1xf32, #tpu.memory_space<vmem>>, %arg6: memref<8x128xf32, #tpu.memory_space<vmem>>, %arg7: memref<8x128xf32, #tpu.memory_space<vmem>>) attributes {dimension_semantics = [#tpu.dimension_semantics<parallel>, #tpu.dimension_semantics<arbitrary>], iteration_bounds = array<i64: 2, 1>, scalar_prefetch = 0 : i64, scratch_operands = 2 : i64, tpu.core_type = #tpu.core_type<tc>, window_params = [{transform_indices = @transform_0, window_bounds = array<i64: 8, 128>}, {transform_indices = @transform_1, window_bounds = array<i64: 8, 128>}, {transform_indices = @transform_2, window_bounds = array<i64: 8, 1>}, {transform_indices = @transform_3, window_bounds = array<i64: 8, 1>}]} {
    %c0_i32 = arith.constant 0 : i32
    %0 = arith.cmpi eq, %arg1, %c0_i32 : i32
    %1 = arith.extui %0 : i1 to i32
    %c0_i32_0 = arith.constant 0 : i32
    %2 = arith.cmpi ne, %1, %c0_i32_0 : i32
    scf.if %2 {
      %cst_16 = arith.constant 0.000000e+00 : f32
      %23 = vector.broadcast %cst_16 : f32 to vector<8x128xf32>
      %c0_17 = arith.constant 0 : index
      %c0_18 = arith.constant 0 : index
      %24 = vector.load %arg6[%c0_17, %c0_18] : memref<8x128xf32, #tpu.memory_space<vmem>>, vector<8x128xf32>
      tpu.vector_store %arg6[%c0_17, %c0_18], %23 {strides = array<i32>} : memref<8x128xf32, #tpu.memory_space<vmem>>, vector<8x128xf32>,
      %cst_19 = arith.constant 0.000000e+00 : f32
      %25 = vector.broadcast %cst_19 : f32 to vector<8x128xf32>
      %c0_20 = arith.constant 0 : index
      %c0_21 = arith.constant 0 : index
      %26 = vector.load %arg7[%c0_20, %c0_21] : memref<8x128xf32, #tpu.memory_space<vmem>>, vector<8x128xf32>
      tpu.vector_store %arg7[%c0_20, %c0_21], %25 {strides = array<i32>} : memref<8x128xf32, #tpu.memory_space<vmem>>, vector<8x128xf32>,
    } else {
    }
    %c0 = arith.constant 0 : index
    %c0_1 = arith.constant 0 : index
    %3 = vector.load %arg2[%c0, %c0_1] : memref<8x128xf32, #tpu.memory_space<vmem>>, vector<8x128xf32>
    %c0_2 = arith.constant 0 : index
    %c0_3 = arith.constant 0 : index
    %4 = vector.load %arg3[%c0_2, %c0_3] : memref<8x128xf32, #tpu.memory_space<vmem>>, vector<8x128xf32>
    %cst = arith.constant 5.000000e-01 : f32
    %5 = vector.broadcast %cst : f32 to vector<8x128xf32>
    %6 = arith.mulf %5, %3 : vector<8x128xf32>
    %7 = math.tanh %6 : vector<8x128xf32>
    %cst_4 = arith.constant 1.000000e+00 : f32
    %8 = vector.broadcast %cst_4 : f32 to vector<8x128xf32>
    %9 = arith.addf %7, %8 : vector<8x128xf32>
    %cst_5 = arith.constant 5.000000e-01 : f32
    %10 = vector.broadcast %cst_5 : f32 to vector<8x128xf32>
    %11 = arith.mulf %10, %9 : vector<8x128xf32>
    %12 = arith.mulf %11, %4 : vector<8x128xf32>
    %13 = arith.addf %11, %4 : vector<8x128xf32>
    %c0_6 = arith.constant 0 : index
    %c0_7 = arith.constant 0 : index
    %14 = vector.load %arg6[%c0_6, %c0_7] : memref<8x128xf32, #tpu.memory_space<vmem>>, vector<8x128xf32>
    %15 = arith.addf %14, %12 : vector<8x128xf32>
    %c0_8 = arith.constant 0 : index
    %c0_9 = arith.constant 0 : index
    %16 = vector.load %arg6[%c0_8, %c0_9] : memref<8x128xf32, #tpu.memory_space<vmem>>, vector<8x128xf32>
    tpu.vector_store %arg6[%c0_8, %c0_9], %15 {strides = array<i32>} : memref<8x128xf32, #tpu.memory_space<vmem>>, vector<8x128xf32>,
    %c0_10 = arith.constant 0 : index
    %c0_11 = arith.constant 0 : index
    %17 = vector.load %arg7[%c0_10, %c0_11] : memref<8x128xf32, #tpu.memory_space<vmem>>, vector<8x128xf32>
    %18 = arith.addf %17, %13 : vector<8x128xf32>
    %c0_12 = arith.constant 0 : index
    %c0_13 = arith.constant 0 : index
    %19 = vector.load %arg7[%c0_12, %c0_13] : memref<8x128xf32, #tpu.memory_space<vmem>>, vector<8x128xf32>
    tpu.vector_store %arg7[%c0_12, %c0_13], %18 {strides = array<i32>} : memref<8x128xf32, #tpu.memory_space<vmem>>, vector<8x128xf32>,
    %c0_i32_14 = arith.constant 0 : i32
    %20 = arith.cmpi eq, %arg1, %c0_i32_14 : i32
    %21 = arith.extui %20 : i1 to i32
    %c0_i32_15 = arith.constant 0 : i32
    %22 = arith.cmpi ne, %21, %c0_i32_15 : i32
    scf.if %22 {
      %c0_16 = arith.constant 0 : index
      %c0_17 = arith.constant 0 : index
      %23 = vector.load %arg6[%c0_16, %c0_17] : memref<8x128xf32, #tpu.memory_space<vmem>>, vector<8x128xf32>
      %cst_18 = arith.constant dense<0.000000e+00> : vector<8xf32>
      %24 = vector.multi_reduction <add>, %23, %cst_18 [1] : vector<8x128xf32> to vector<8xf32>
      %25 = vector.shape_cast %24 : vector<8xf32> to vector<8x1xf32>
      %c0_19 = arith.constant 0 : index
      %c0_20 = arith.constant 0 : index
      %26 = vector.load %arg4[%c0_19, %c0_20] : memref<8x1xf32, #tpu.memory_space<vmem>>, vector<8x1xf32>
      tpu.vector_store %arg4[%c0_19, %c0_20], %25 {strides = array<i32>} : memref<8x1xf32, #tpu.memory_space<vmem>>, vector<8x1xf32>,
      %c0_21 = arith.constant 0 : index
      %c0_22 = arith.constant 0 : index
      %27 = vector.load %arg7[%c0_21, %c0_22] : memref<8x128xf32, #tpu.memory_space<vmem>>, vector<8x128xf32>
      %cst_23 = arith.constant dense<0.000000e+00> : vector<8xf32>
      %28 = vector.multi_reduction <add>, %27, %cst_23 [1] : vector<8x128xf32> to vector<8xf32>
      %29 = vector.shape_cast %28 : vector<8xf32> to vector<8x1xf32>
      %c0_24 = arith.constant 0 : index
      %c0_25 = arith.constant 0 : index
      %30 = vector.load %arg5[%c0_24, %c0_25] : memref<8x1xf32, #tpu.memory_space<vmem>>, vector<8x1xf32>
      tpu.vector_store %arg5[%c0_24, %c0_25], %29 {strides = array<i32>} : memref<8x1xf32, #tpu.memory_space<vmem>>, vector<8x1xf32>,
    } else {
    }
    return
  }
  func.func @transform_0(%arg0: i32, %arg1: i32) -> (i32, i32) {
    %c0_i32 = arith.constant 0 : i32
    return %arg0, %arg1 : i32, i32
  }
  func.func @transform_1(%arg0: i32, %arg1: i32) -> (i32, i32) {
    %c0_i32 = arith.constant 0 : i32
    return %arg0, %arg1 : i32, i32
  }
  func.func @transform_2(%arg0: i32, %arg1: i32) -> (i32, i32) {
    %c0_i32 = arith.constant 0 : i32
    %c0_i32_0 = arith.constant 0 : i32
    return %arg0, %c0_i32 : i32, i32
  }
  func.func @transform_3(%arg0: i32, %arg1: i32) -> (i32, i32) {
    %c0_i32 = arith.constant 0 : i32
    %c0_i32_0 = arith.constant 0 : i32
    return %arg0, %c0_i32 : i32, i32
  }
}

</mosaic_0001>

<bundles_post_ra>
// kernel: tpu_custom_call.1
= control target key start
LH: loop header
LB: loop body
LE: loop exit
PB: predicated region body
PF: predicated region fallthrough
CT: control target
= control target key end

     0   :  { %9 = vsyncpa [#allocation5], 0  ;;  %s753_s0 = inlined_call_operand.hbm [shape: f32[16,128], index: 0, kind: input, shape index: {}]   ;;  %s754_s1 = inlined_call_operand.hbm [shape: f32[16,128], index: 1, kind: input, shape index: {}]   ;;  %s755_s2 = inlined_call_operand.vmem [shape: f32[16,1], index: 2, kind: output, shape index: {0}]   ;;  %s756_s3 = inlined_call_operand.vmem [shape: f32[16,1], index: 3, kind: output, shape index: {1}]  }
   0x1   :  { %11 = vsyncpa [#allocation5 + $0x1], 0 }
   0x2   :  { %12 = vsyncpa [#allocation7], 0 }
   0x3   :  { %14 = vsyncpa [#allocation7 + $0x1], 0  ;;  %s624_s12 = smov 0   ;;  %s626_s13 = smov 0  }
   0x4   :  { %s628_s14 = smov 0   ;;  %s630_s15 = smov 0  }
   0x5   :  { %s632_s16 = smov 0   ;;  %s634_s17 = smov 0  }
   0x6 LB: > { %s413_s18 = sadd.s32 4294967295, %s600_s17   ;;  %s32_s19 = sadd.s32 1, %s596_s16  ;;  %s600_s17 = sphi %s634_s17, %s20_s17   ;;  %s596_s16 = sphi %s632_s16, %s765_s16   ;;  %s592_s15 = sphi %s630_s15, %s764_s15   ;;  %s588_s14 = sphi %s628_s14, %s763_s14   ;;  %s584_s13 = sphi %s626_s13, %s762_s13   ;;  %s580_s12 = sphi %s624_s12, %s761_s12  }
   0x7   : > { %p34_p0 = scmp.ge.s32.totalorder %s32_s19, 2  ;;  %s41_s20 = sadd.s32 1, %s588_s14 }
   0x8   : > { %p48_p1 = scmp.ne.s32.totalorder %s588_s14, %s584_s13  ;;  %p49_p2 = scmp.eq.s32.totalorder %s600_s17, 0 }
   0x9   : > { %s767_s19 = smov (%p34_p0, %s32_s19), 0  ;;  %p54_p4 = scmp.ne.s32.totalorder %s584_s13, %s580_s12 }
   0xa   : > { %p660_p3 = por %p49_p2, %p48_p1  ;;  %s36_s22 = ssub.s32 %s596_s16, %s767_s19 }
   0xb   : > { %p55_p5 = scmp.eq.s32.totalorder %s413_s18, 0  ;;  %p39_p6 = scmp.eq.s32.totalorder %s36_s22, 0 }
   0xc   : > { %p439_p8 = scmp.lt.s32.totalorder %s600_s17, 2  ;;  %s676_s25 = sand.u32 1, %s588_s14  }
   0xd   : > { %p667_p7 = por %p55_p5, %p54_p4  ;;  %s418_s26 = sshll.u32 %s596_s16, 7 }
   0xe   : > { %s673_s24 = scalar_select %p39_p6, %s588_s14, %s41_s20  }
   0xf   : > { %s417_s27 = sshll.u32 %s676_s25, 3  ;;  %s168_s30 = scalar_lea.hbm %s753_s0, %s418_s26 }
  0x10   : > { %s162_s4 = scalar_lea.vmem [#allocation4], %s417_s27  ;;  %p685_p9 = pnand %p439_p8, %p660_p3 }
  0x11   : > { %s170_s5 = sshll.u32 %s162_s4, 4  ;;  %p421_p10 = scmp.ge.s32.totalorder %s600_s17, 1  ;;  %s171_s5 = int_to_ptr.vmem [resolvable:$true] %s170_s5 }
  0x12   : > { %p194_p11 = scmp.lt.s32.totalorder %s600_s17, 3  ;;  %s159_s7 = scalar_lea.sflag [#allocation5], %s676_s25 }
  0x13   : > { %p492_p12 = pneg %p685_p9  ;;  %s503_s8 = scalar_lea.vmem %s171_s5, 128 }
  0x14   : > { %p504_p13 = scmp.ne.s32.totalorder %s171_s5, %s503_s8  ;;  %s602_s9 = smov [#allocation4]  }
  0x15   : > { %s508_s10 = sshll.u32 %s602_s9, 4  ;;  %s509_s10 = int_to_ptr.vmem [resolvable:$false] %s508_s10 }
  0x16   : > { %p506_p0 = pnand %p504_p13, %p492_p12  ;;  %s510_s11 = scalar_lea.vmem %s509_s10, 256 }
  0x17   : > { %p511_p2 = scmp.lt.s32.totalorder %s171_s5, %s509_s10  ;;  %p512_p3 = scmp.lt.s32.totalorder %s510_s11, %s503_s8 }
  0x18   : > { %p507_p1 = pneg %p506_p0 }
  0x19   : > { %p513_p4 = por %p512_p3, %p511_p2 }
  0x1b   : > { %p514_p5 = pnand %p513_p4, %p507_p1 }
  0x1d   : > { %517 = shalt.err (!%p514_p5)
}
  0x1e   : > { %435 = dma.hbm_to_vmem [thread:$0]  (!%p685_p9), %s168_s30, 128, %s171_s5, %s159_s7  }
  0x1f   : > { %p703_p6 = pnand %p421_p10, %p194_p11  ;;  %s187_s21 = scalar_lea.hbm %s754_s1, %s418_s26 }
  0x20   : > { %s181_s22 = scalar_lea.vmem [#allocation6], %s417_s27  ;;  %s178_s29 = scalar_lea.sflag [#allocation7], %s676_s25 }
  0x21   : > { %s189_s28 = sshll.u32 %s181_s22, 4  ;;  %s603_s30 = smov [#allocation6]   ;;  %s190_s28 = int_to_ptr.vmem [resolvable:$true] %s189_s28 }
  0x22   : > { %s531_s4 = scalar_lea.vmem %s190_s28, 128  ;;  %s536_s5 = sshll.u32 %s603_s30, 4  ;;  %s537_s5 = int_to_ptr.vmem [resolvable:$false] %s536_s5 }
  0x23   : > { %p532_p8 = scmp.ne.s32.totalorder %s190_s28, %s531_s4  ;;  %s538_s7 = scalar_lea.vmem %s537_s5, 256 }
  0x24   : > { %p539_p10 = scmp.lt.s32.totalorder %s190_s28, %s537_s5  ;;  %p540_p11 = scmp.lt.s32.totalorder %s538_s7, %s531_s4 }
  0x25   : > { %p534_p13 = pnand %p532_p8, %p492_p12 }
  0x26   : > { %p541_p1 = por %p540_p11, %p539_p10 }
  0x27   : > { %p535_p0 = pneg %p534_p13 }
  0x29   : > { %p542_p2 = pnand %p541_p1, %p535_p0 }
  0x2b   : > { %545 = shalt.err (!%p542_p2)
}
  0x2c   : > { %438 = dma.hbm_to_vmem [thread:$0]  (!%p685_p9), %s187_s21, 128, %s190_s28, %s178_s29  }
  0x2d   : > { %198 = sbr.rel (%p703_p6) target bundleno = 219 (0xdb), region = 28  ;;  %s200_s25 = sand.u32 (!%p703_p6), 1, %s584_s13  }
  0x2e   : > { %s422_s26 = sshll.u32 (!%p703_p6), %s200_s25, 3  ;;  %s201_s27 = scalar_lea.sflag (!%p703_p6), [#allocation5], %s200_s25 }
  0x2f   : > { %s204_s8 = scalar_lea.vmem (!%p703_p6), [#allocation4], %s422_s26 }
  0x32   : > { %571 = dma.done.wait (%p667_p7), %s201_s27, 128  }
  0x33   : > { %573 = vsyncadd (%p667_p7), %s201_s27, 4294967168  ;;  %s210_s9 = scalar_lea.sflag [#allocation7], %s200_s25  ;;  %s213_s10 = scalar_lea.vmem [#allocation6], %s422_s26 }
  0x34   : > { %575 = dma.done.wait (%p667_p7), %s210_s9, 128  }
  0x35   : > { %577 = vsyncadd (%p667_p7), %s210_s9, 4294967168  ;;  %v258_v0 = vld [vmem:[%s204_s8] sm:$0xff]  ;;  %v259_v4 = vld [vmem:[%s213_s10] sm:$0xff]  ;;  %p244_p9 = scmp.lt.s32.totalorder %s592_s15, 1  ;;  %vm278_vm0 = vcmask 7168  }
  0x36   : > { %v260_v1 = vmul.f32 0.5, %v258_v0 }
  0x37   : > { %s769_s15 = smov (!%p244_p9, %s592_s15), 1 }
  0x38   : > { %488 = vtanh.f32 %v260_v1  ;;  %s424_s6 = sshll.u32 %s769_s15, 3 }
  0x39   : > { %s247_s23 = scalar_lea.vmem %s755_s2, %s424_s6  ;;  %s251_s21 = scalar_lea.vmem %s756_s3, %s424_s6 }
  0x45   : > { %v489_v2 = vpop.eup %488 }
  0x46   : > { %v262_v3 = vadd.f32 1.0, %v489_v2 }
  0x48   : > { %v263_v5 = vmul.f32 0.5, %v262_v3 }
  0x4a   : > { %v264_v6 = vmul.f32 %v263_v5, %v259_v4  ;;  %v265_v7 = vadd.f32 %v263_v5, %v259_v4 }
  0x4c   : > { %276 = vadd.xlane.f32.xlu0 %v264_v6 }
  0x50   : > { %281 = vadd.xlane.f32.xlu0 %v265_v7 }
  0xd5   : > { %v277_v8 = vpop.xlane.xlu0 %276 }
  0xd6   : > { %279 = vst.msk [vmem:[%s247_s23] sm:$0xff] %vm278_vm0, %v277_v8 }
  0xd9   : > { %v282_v9 = vpop.xlane.xlu0 %281 }
  0xda   : > { %283 = vst.msk [vmem:[%s251_s21] sm:$0xff] %vm278_vm0, %v282_v9 }
  0xdb PF: > { %s20_s17 = sadd.s32 1, %s600_s17   ;;  %s761_s12 = smov %s584_s13 }
  0xdc   : > { %p17_p7 = scmp.ge.s32.totalorder %s20_s17, 4   ;;  %s762_s13 = smov %s588_s14 }
  0xdd   : > { %s763_s14 = smov %s673_s24  ;;  %s764_s15 = smov %s596_s16 }
  0xde   : > { %s765_s16 = smov %s767_s19  ;;  %19 = sbr.rel (!%p17_p7) target bundleno = 6 (0x6), region = 101 }
  0xe3   :  { %317 = vsyncpa [#allocation5], 1 }
  0xe4   :  { %319 = vsyncpa [#allocation5 + $0x1], 1 }
  0xe5   :  { %320 = vsyncpa [#allocation7], 1 }
  0xe6   :  { %322 = vsyncpa [#allocation7 + $0x1], 1 }

</bundles_post_ra>
